<compile_context>
chip_gen: v7x
topology: tpu7x:2x2x1
jax: 0.10.0
libtpu: 0.0.40
codegen_flags: <defaults>
</compile_context>

<pallas_src>
import functools

import jax
import jax.numpy as jnp
from jax.experimental import pallas as pl
from jax.experimental.pallas import tpu as pltpu


def mlp_softmax_kernel(x_ref, w1_ref, b1_ref, w2_ref, b2_ref, w3_ref, b3_ref, ot_ref):
    # Layers 1-2 in [batch, feature] orientation (MXU matmuls, f32 accumulation,
    # f32 bias/ReLU on the VPU).
    h = jnp.dot(x_ref[...], w1_ref[...], preferred_element_type=jnp.float32) + b1_ref[...]
    h = jnp.maximum(h, 0.0)
    h = jnp.dot(h.astype(w2_ref.dtype), w2_ref[...],
                preferred_element_type=jnp.float32) + b2_ref[...]
    h = jnp.maximum(h, 0.0)
    # Layer 3 computed transposed: logits^T = W3_pt @ h^T -> [D_out, TILE_B]
    # (contract the K=32 dims of both operands). Output lanes carry the batch.
    logits_t = jax.lax.dot_general(
        w3_ref[...], h.astype(w3_ref.dtype),
        dimension_numbers=(((1,), (1,)), ((), ())),
        preferred_element_type=jnp.float32) + b3_ref[...]
    # Numerically stable softmax over the feature axis (sublane axis here).
    m = jnp.max(logits_t, axis=0, keepdims=True)
    e = jnp.exp(logits_t - m)
    inv = pl.reciprocal(jnp.sum(e, axis=0, keepdims=True), approx=True)  # EUP slot
    ot_ref[...] = (e * inv).astype(ot_ref.dtype)


def _round_up(n, m):
    return ((n + m - 1) // m) * m


@functools.partial(jax.jit, static_argnames=("tile_b", "compute_dtype"))
def mlp_forward(x, params, *, tile_b=None, compute_dtype=jnp.float32):
    """x: [B, D_in] float32 -> [B, D_out] float32 softmax probabilities."""
    B, d_in = x.shape
    d_hid = params["w1"].shape[1]
    d_out = params["w3"].shape[0]

    # Matmul-input dtype (bf16 halves the dominant HBM read on v6e/v7x);
    # biases and all elementwise/softmax math stay f32.
    xc = x.astype(compute_dtype)
    w1 = params["w1"].astype(compute_dtype)
    w2 = params["w2"].astype(compute_dtype)
    w3 = params["w3"].astype(compute_dtype)
    b1 = params["b1"].astype(jnp.float32)
    b2 = params["b2"].astype(jnp.float32)
    b3 = params["b3"].astype(jnp.float32)

    # Large batch tile (amortizes the ~0.35us/step grid overhead), multiple of 128
    # so the lane axis of the [D_out, TILE_B] output blocks is dense.
    if tile_b is None:
        tile_b = min(1024, _round_up(B, 128))
    tile_b = _round_up(tile_b, 128)
    b_pad = _round_up(B, tile_b)
    if b_pad != B:
        xc = jnp.pad(xc, ((0, b_pad - B), (0, 0)))  # zero rows -> finite softmax, sliced off

    out_t = pl.pallas_call(
        mlp_softmax_kernel,
        out_shape=jax.ShapeDtypeStruct((d_out, b_pad), jnp.float32),
        grid=(pl.cdiv(b_pad, tile_b),),
        in_specs=[
            pl.BlockSpec((tile_b, d_in), lambda i: (i, 0)),   # x: batch-tiled, pipelined
            pl.BlockSpec((d_in, d_hid), lambda i: (0, 0)),    # weights/biases: constant
            pl.BlockSpec((1, d_hid), lambda i: (0, 0)),       # block index -> DMA'd once,
            pl.BlockSpec((d_hid, d_hid), lambda i: (0, 0)),   # resident in VMEM across
            pl.BlockSpec((1, d_hid), lambda i: (0, 0)),       # all grid steps
            pl.BlockSpec((d_out, d_hid), lambda i: (0, 0)),
            pl.BlockSpec((d_out, 1), lambda i: (0, 0)),
        ],
        out_specs=pl.BlockSpec((d_out, tile_b), lambda i: (0, i)),  # lane-dense stores
        compiler_params=pltpu.CompilerParams(
            dimension_semantics=("parallel",)),  # megacore sharding on v7x
    )(xc, w1, b1, w2, b2, w3, b3)

    # [D_out, B_pad] -> [B, D_out]: tiny layout plumbing outside the kernel.
    return out_t[:, :B].T


def init_params(key, d_in=16, d_hid=32, d_out=8):
    """Deterministic synthetic parameters (PyTorch-style uniform init).

    Layouts: w1/w2 are pre-transposed to [in, out]; w3 is kept in PyTorch's
    [out, in] layout because the kernel computes the last layer transposed.
    """
    ks = jax.random.split(key, 6)

    def lin(kw, kb, fan_in, fan_out, transposed):
        bound = fan_in ** -0.5
        shape = (fan_in, fan_out) if transposed else (fan_out, fan_in)
        w = jax.random.uniform(kw, shape, jnp.float32, -bound, bound)
        b = jax.random.uniform(kb, (fan_out,), jnp.float32, -bound, bound)
        return w, b

    w1, b1 = lin(ks[0], ks[1], d_in, d_hid, True)
    w2, b2 = lin(ks[2], ks[3], d_hid, d_hid, True)
    w3, b3 = lin(ks[4], ks[5], d_hid, d_out, False)
    return {
        "w1": w1, "b1": b1.reshape(1, d_hid),
        "w2": w2, "b2": b2.reshape(1, d_hid),
        "w3": w3, "b3": b3.reshape(d_out, 1),
    }


def reference_forward(x, p):
    h = jnp.maximum(x @ p["w1"] + p["b1"], 0.0)
    h = jnp.maximum(h @ p["w2"] + p["b2"], 0.0)
    logits = h @ p["w3"].T + p["b3"].T
    return jax.nn.softmax(logits, axis=1)


if __name__ == "__main__":
    key = jax.random.PRNGKey(0)
    k_x, k_p, k_x2 = jax.random.split(key, 3)

    D_IN, D_HID, D_OUT = 16, 32, 8
    params = init_params(k_p, D_IN, D_HID, D_OUT)

    # Small module-consistent demo batch.
    B = 2
    x = jax.random.normal(k_x, (B, D_IN), dtype=jnp.float32)
    out = jax.block_until_ready(mlp_forward(x, params))
    ref = reference_forward(x, params)
    assert out.shape == (B, D_OUT)
    assert jnp.allclose(out, ref, atol=2e-3, rtol=1e-3), "f32 mismatch vs reference"
    assert jnp.allclose(jnp.sum(out, axis=1), jnp.ones((B,)), atol=5e-3)

    # Larger batch exercising multiple grid steps + padding.
    B2 = 300
    x2 = jax.random.normal(k_x2, (B2, D_IN), dtype=jnp.float32)
    out2 = jax.block_until_ready(mlp_forward(x2, params, tile_b=128))
    ref2 = reference_forward(x2, params)
    assert out2.shape == (B2, D_OUT)
    assert jnp.allclose(out2, ref2, atol=2e-3, rtol=1e-3), "multi-tile mismatch"

    # bf16 matmul-input path (v6e/v7x bandwidth optimization), f32 accum/epilogue.
    out_bf16 = jax.block_until_ready(
        mlp_forward(x2, params, compute_dtype=jnp.bfloat16))
    assert out_bf16.shape == (B2, D_OUT)
    assert jnp.allclose(out_bf16, ref2, atol=5e-2), "bf16 path diverged"
    assert jnp.allclose(jnp.sum(out_bf16, axis=1), jnp.ones((B2,)), atol=2e-2)

    print("KERNEL_OK")
</pallas_src>

<mosaic_0001>
module attributes {stable_mosaic.version = 11 : i64} {
  func.func @mlp_softmax_kernel(%arg0: i32, %arg1: memref<128x16xf32, #tpu.memory_space<vmem>>, %arg2: memref<16x32xf32, #tpu.memory_space<vmem>>, %arg3: memref<1x32xf32, #tpu.memory_space<vmem>>, %arg4: memref<32x32xf32, #tpu.memory_space<vmem>>, %arg5: memref<1x32xf32, #tpu.memory_space<vmem>>, %arg6: memref<8x32xf32, #tpu.memory_space<vmem>>, %arg7: memref<8x1xf32, #tpu.memory_space<vmem>>, %arg8: memref<8x128xf32, #tpu.memory_space<vmem>>) attributes {dimension_semantics = [#tpu.dimension_semantics<parallel>], iteration_bounds = array<i64: 1>, scalar_prefetch = 0 : i64, scratch_operands = 0 : i64, tpu.core_type = #tpu.core_type<tc>, window_params = [{transform_indices = @transform_0, window_bounds = array<i64: 128, 16>}, {pipeline_mode = #tpu.pipeline_mode<synchronous>, transform_indices = @transform_1, window_bounds = array<i64: 16, 32>}, {pipeline_mode = #tpu.pipeline_mode<synchronous>, transform_indices = @transform_2, window_bounds = array<i64: 1, 32>}, {pipeline_mode = #tpu.pipeline_mode<synchronous>, transform_indices = @transform_3, window_bounds = array<i64: 32, 32>}, {pipeline_mode = #tpu.pipeline_mode<synchronous>, transform_indices = @transform_4, window_bounds = array<i64: 1, 32>}, {pipeline_mode = #tpu.pipeline_mode<synchronous>, transform_indices = @transform_5, window_bounds = array<i64: 8, 32>}, {pipeline_mode = #tpu.pipeline_mode<synchronous>, transform_indices = @transform_6, window_bounds = array<i64: 8, 1>}, {transform_indices = @transform_7, window_bounds = array<i64: 8, 128>}]} {
    %c0 = arith.constant 0 : index
    %c0_0 = arith.constant 0 : index
    %0 = vector.load %arg1[%c0, %c0_0] : memref<128x16xf32, #tpu.memory_space<vmem>>, vector<128x16xf32>
    %c0_1 = arith.constant 0 : index
    %c0_2 = arith.constant 0 : index
    %1 = vector.load %arg2[%c0_1, %c0_2] : memref<16x32xf32, #tpu.memory_space<vmem>>, vector<16x32xf32>
    %cst = arith.constant dense<0.000000e+00> : vector<128x32xf32>
    %2 = tpu.matmul %0, %1, %cst {dimension_numbers = #tpu.dot_dimension_numbers<[1], [0], [0], [1], [0, 0, 1, 1], [], []>} : vector<128x16xf32>, vector<16x32xf32>, vector<128x32xf32> -> vector<128x32xf32>
    %c0_3 = arith.constant 0 : index
    %c0_4 = arith.constant 0 : index
    %3 = vector.load %arg3[%c0_3, %c0_4] : memref<1x32xf32, #tpu.memory_space<vmem>>, vector<1x32xf32>
    %4 = vector.broadcast %3 : vector<1x32xf32> to vector<128x32xf32>
    %5 = arith.addf %2, %4 : vector<128x32xf32>
    %cst_5 = arith.constant 0.000000e+00 : f32
    %6 = vector.broadcast %cst_5 : f32 to vector<128x32xf32>
    %7 = arith.maximumf %5, %6 : vector<128x32xf32>
    %c0_6 = arith.constant 0 : index
    %c0_7 = arith.constant 0 : index
    %8 = vector.load %arg4[%c0_6, %c0_7] : memref<32x32xf32, #tpu.memory_space<vmem>>, vector<32x32xf32>
    %cst_8 = arith.constant dense<0.000000e+00> : vector<128x32xf32>
    %9 = tpu.matmul %7, %8, %cst_8 {dimension_numbers = #tpu.dot_dimension_numbers<[1], [0], [0], [1], [0, 0, 1, 1], [], []>} : vector<128x32xf32>, vector<32x32xf32>, vector<128x32xf32> -> vector<128x32xf32>
    %c0_9 = arith.constant 0 : index
    %c0_10 = arith.constant 0 : index
    %10 = vector.load %arg5[%c0_9, %c0_10] : memref<1x32xf32, #tpu.memory_space<vmem>>, vector<1x32xf32>
    %11 = vector.broadcast %10 : vector<1x32xf32> to vector<128x32xf32>
    %12 = arith.addf %9, %11 : vector<128x32xf32>
    %cst_11 = arith.constant 0.000000e+00 : f32
    %13 = vector.broadcast %cst_11 : f32 to vector<128x32xf32>
    %14 = arith.maximumf %12, %13 : vector<128x32xf32>
    %c0_12 = arith.constant 0 : index
    %c0_13 = arith.constant 0 : index
    %15 = vector.load %arg6[%c0_12, %c0_13] : memref<8x32xf32, #tpu.memory_space<vmem>>, vector<8x32xf32>
    %cst_14 = arith.constant dense<0.000000e+00> : vector<8x128xf32>
    %16 = tpu.matmul %15, %14, %cst_14 {dimension_numbers = #tpu.dot_dimension_numbers<[1], [1], [0], [0], [0, 0, 1, 0], [], []>} : vector<8x32xf32>, vector<128x32xf32>, vector<8x128xf32> -> vector<8x128xf32>
    %c0_15 = arith.constant 0 : index
    %c0_16 = arith.constant 0 : index
    %17 = vector.load %arg7[%c0_15, %c0_16] : memref<8x1xf32, #tpu.memory_space<vmem>>, vector<8x1xf32>
    %18 = vector.broadcast %17 : vector<8x1xf32> to vector<8x128xf32>
    %19 = arith.addf %16, %18 : vector<8x128xf32>
    %cst_17 = arith.constant dense<0xFF800000> : vector<128xf32>
    %20 = vector.multi_reduction <maximumf>, %19, %cst_17 [0] : vector<8x128xf32> to vector<128xf32>
    %21 = vector.shape_cast %20 : vector<128xf32> to vector<1x128xf32>
    %22 = vector.broadcast %21 : vector<1x128xf32> to vector<8x128xf32>
    %23 = arith.subf %19, %22 : vector<8x128xf32>
    %24 = math.exp %23 : vector<8x128xf32>
    %cst_18 = arith.constant dense<0.000000e+00> : vector<128xf32>
    %25 = vector.multi_reduction <add>, %24, %cst_18 [0] : vector<8x128xf32> to vector<128xf32>
    %26 = vector.shape_cast %25 : vector<128xf32> to vector<1x128xf32>
    %27 = tpu.reciprocal %26 {approx = true} : vector<1x128xf32> -> vector<1x128xf32>
    %28 = vector.broadcast %27 : vector<1x128xf32> to vector<8x128xf32>
    %29 = arith.mulf %24, %28 : vector<8x128xf32>
    %c0_19 = arith.constant 0 : index
    %c0_20 = arith.constant 0 : index
    %30 = vector.load %arg8[%c0_19, %c0_20] : memref<8x128xf32, #tpu.memory_space<vmem>>, vector<8x128xf32>
    tpu.vector_store %arg8[%c0_19, %c0_20], %29 {strides = array<i32>} : memref<8x128xf32, #tpu.memory_space<vmem>>, vector<8x128xf32>,
    return
  }
  func.func @transform_0(%arg0: i32) -> (i32, i32) {
    %c0_i32 = arith.constant 0 : i32
    %c0_i32_0 = arith.constant 0 : i32
    return %arg0, %c0_i32 : i32, i32
  }
  func.func @transform_1(%arg0: i32) -> (i32, i32) {
    %c0_i32 = arith.constant 0 : i32
    %c0_i32_0 = arith.constant 0 : i32
    %c0_i32_1 = arith.constant 0 : i32
    return %c0_i32, %c0_i32_0 : i32, i32
  }
  func.func @transform_2(%arg0: i32) -> (i32, i32) {
    %c0_i32 = arith.constant 0 : i32
    %c0_i32_0 = arith.constant 0 : i32
    %c0_i32_1 = arith.constant 0 : i32
    return %c0_i32, %c0_i32_0 : i32, i32
  }
  func.func @transform_3(%arg0: i32) -> (i32, i32) {
    %c0_i32 = arith.constant 0 : i32
    %c0_i32_0 = arith.constant 0 : i32
    %c0_i32_1 = arith.constant 0 : i32
    return %c0_i32, %c0_i32_0 : i32, i32
  }
  func.func @transform_4(%arg0: i32) -> (i32, i32) {
    %c0_i32 = arith.constant 0 : i32
    %c0_i32_0 = arith.constant 0 : i32
    %c0_i32_1 = arith.constant 0 : i32
    return %c0_i32, %c0_i32_0 : i32, i32
  }
  func.func @transform_5(%arg0: i32) -> (i32, i32) {
    %c0_i32 = arith.constant 0 : i32
    %c0_i32_0 = arith.constant 0 : i32
    %c0_i32_1 = arith.constant 0 : i32
    return %c0_i32, %c0_i32_0 : i32, i32
  }
  func.func @transform_6(%arg0: i32) -> (i32, i32) {
    %c0_i32 = arith.constant 0 : i32
    %c0_i32_0 = arith.constant 0 : i32
    %c0_i32_1 = arith.constant 0 : i32
    return %c0_i32, %c0_i32_0 : i32, i32
  }
  func.func @transform_7(%arg0: i32) -> (i32, i32) {
    %c0_i32 = arith.constant 0 : i32
    %c0_i32_0 = arith.constant 0 : i32
    return %c0_i32, %arg0 : i32, i32
  }
}

</mosaic_0001>

<bundles_post_ra>
// kernel: mlp_forward.1
= control target key start
LH: loop header
LB: loop body
LE: loop exit
PB: predicated region body
PF: predicated region fallthrough
CT: control target
= control target key end

     0   :  { %vm51_vm0 = vcmask 130048   ;;  %vm272_vm1 = vcmask 261120   ;;  %vm887_vm2 = vmmov 0   ;;  %s1074_s1 = inlined_call_operand.vmem [shape: f32[16,32], index: 1, kind: input, shape index: {}]   ;;  %s1075_s0 = inlined_call_operand.vmem [shape: f32[128,16], index: 0, kind: input, shape index: {}]   ;;  %s1076_s3 = inlined_call_operand.vmem [shape: f32[32,32], index: 3, kind: input, shape index: {}]   ;;  %s1077_s2 = inlined_call_operand.vmem [shape: f32[1,32], index: 2, kind: input, shape index: {}]   ;;  %s1078_s6 = inlined_call_operand.vmem [shape: f32[8,1], index: 6, kind: input, shape index: {}]   ;;  %s1079_s4 = inlined_call_operand.vmem [shape: f32[1,32], index: 4, kind: input, shape index: {}]   ;;  %s1080_s5 = inlined_call_operand.vmem [shape: f32[8,32], index: 5, kind: input, shape index: {}]   ;;  %s1081_s7 = inlined_call_operand.vmem [shape: f32[8,128], index: 7, kind: output, shape index: {}]  }
   0x1   :  { %v42_v0 = vld [vmem:[%s1074_s1] sm:$0xff]  ;;  %v43_v1 = vld [vmem:[%s1074_s1 + $0x8] sm:$0xff]  ;;  %v28_v5 = vld [vmem:[%s1075_s0 + $0x10] sm:$0xff] }
   0x2   :  { %v26_v2 = vld [vmem:[%s1075_s0] sm:$0xff]  ;;  %v833_v3 = vpack.c.bf16 %v43_v1, %v42_v0  ;;  %v27_v4 = vld [vmem:[%s1075_s0 + $0x8] sm:$0xff]  ;;  %v263_v8 = vld [vmem:[%s1076_s3 + $0x10] sm:$0xff] }
   0x3   :  { %742 = vmatprep.mubr.msk.f32.mxu1 %vm51_vm0, %v26_v2  ;;  %v261_v6 = vld [vmem:[%s1076_s3] sm:$0xff]  ;;  %v262_v7 = vld [vmem:[%s1076_s3 + $0x8] sm:$0xff]  ;;  %v264_v10 = vld [vmem:[%s1076_s3 + $0x18] sm:$0xff] }
   0x4   :  { %834 = vmatprep.subr.bf16.mxu1 %v833_v3  ;;  %v837_v9 = vpack.c.bf16 %v262_v7, %v261_v6  ;;  %v29_v11 = vld [vmem:[%s1075_s0 + $0x18] sm:$0xff]  ;;  %v841_v12 = vpack.c.bf16 %v264_v10, %v263_v8  ;;  %v30_v13 = vld [vmem:[%s1075_s0 + $0x20] sm:$0xff]  ;;  %v31_v14 = vld [vmem:[%s1075_s0 + $0x28] sm:$0xff]  ;;  %v886_v10 = vmov 0.0|0.0  }
   0x5   :  { %836 = vmatpush3.bf16.msra.mxu1 %v833_v3  ;;  %v32_v15 = vld [vmem:[%s1075_s0 + $0x30] sm:$0xff]  ;;  %v33_v16 = vld [vmem:[%s1075_s0 + $0x38] sm:$0xff]  ;;  %v34_v17 = vld [vmem:[%s1075_s0 + $0x40] sm:$0xff]  ;;  %845 = vmatprep.subr.bf16.mxu0 %v886_v10 }
   0x6   :  { %838 = vmatprep.subr.bf16.mxu1 %v837_v9  ;;  %v35_v18 = vld [vmem:[%s1075_s0 + $0x48] sm:$0xff]  ;;  %v36_v19 = vld [vmem:[%s1075_s0 + $0x50] sm:$0xff]  ;;  %v37_v20 = vld [vmem:[%s1075_s0 + $0x58] sm:$0xff] }
   0x7   :  { %v38_v21 = vld [vmem:[%s1075_s0 + $0x60] sm:$0xff]  ;;  %v39_v22 = vld [vmem:[%s1075_s0 + $0x68] sm:$0xff]  ;;  %v40_v23 = vld [vmem:[%s1075_s0 + $0x70] sm:$0xff] }
   0x8   :  { %743 = vmatmul.mubr.msk.f32.vlgmr.msra.gmra.mrb[0].mxu1 %vm51_vm0, %v27_v4  ;;  %v41_v24 = vld [vmem:[%s1075_s0 + $0x78] sm:$0xff]  ;;  %v632_v25 = vld [vmem:[%s1077_s2] ss:$0 sm:$0xff]  ;;  %vm1040_vm3 = vmpackc.low %vm272_vm1, %vm272_vm1 }
   0x9   :  { %745 = vmatprep.mubr.msk.f32.mxu1 %vm51_vm0, %v28_v5  ;;  %840 = vmatpush3.bf16.msra.mxu1 %v837_v9 }
   0xa   :  { %842 = vmatprep.subr.bf16.mxu1 %v841_v12 }
   0xc   :  { %746 = vmatmul.mubr.msk.f32.gmra.mrb[2].mxu1 %vm51_vm0, %v29_v11  ;;  %v888_v11 = vmov 0.0  }
   0xd   :  { %748 = vmatprep.mubr.msk.f32.mxu1 %vm51_vm0, %v30_v13  ;;  %844 = vmatpush3.bf16.msra.mxu1 %v841_v12  ;;  %v889_v12 = vmov 0   ;;  %v483_v13 = vld [vmem:[%s1078_s6] sm:$0xff] }
   0xe   :  { %830 = vmatprep.mubr.msk.f32.mxu0 %vm887_vm2, %v888_v11  ;;  %881 = vset.pattern.permute.xlu0 %v889_v12 }
   0xf   :  { %486 = vperm.xlu0 %881, %v483_v13  }
  0x10   :  { %749 = vmatmul.mubr.msk.f32.gmra.mrb[4].mxu1 %vm51_vm0, %v31_v14  ;;  %v649_v14 = vld [vmem:[%s1079_s4] ss:$0 sm:$0xff] }
  0x11   :  { %751 = vmatprep.mubr.msk.f32.mxu1 %vm51_vm0, %v32_v15 }
  0x14   :  { %752 = vmatmul.mubr.msk.f32.gmra.mrb[6].mxu1 %vm51_vm0, %v33_v16 }
  0x15   :  { %754 = vmatprep.mubr.msk.f32.mxu1 %vm51_vm0, %v34_v17 }
  0x18   :  { %755 = vmatmul.mubr.msk.f32.gmra.mrb[8].mxu1 %vm51_vm0, %v35_v18 }
  0x19   :  { %757 = vmatprep.mubr.msk.f32.mxu1 %vm51_vm0, %v36_v19 }
  0x1c   :  { %758 = vmatmul.mubr.msk.f32.gmra.mrb[10].mxu1 %vm51_vm0, %v37_v20 }
  0x1d   :  { %760 = vmatprep.mubr.msk.f32.mxu1 %vm51_vm0, %v38_v21 }
  0x20   :  { %761 = vmatmul.mubr.msk.f32.gmra.mrb[12].mxu1 %vm51_vm0, %v39_v22 }
  0x21   :  { %763 = vmatprep.mubr.msk.f32.mxu1 %vm51_vm0, %v40_v23 }
  0x24   :  { %764 = vmatmul.mubr.msk.f32.gmra.mrb[14].mxu1 %vm51_vm0, %v41_v24 }
  0xdb   :  { %v744_v26 = vpop.f32.mrb[0].mxu1 }
  0xdc   :  { %v172_v27 = vadd.f32 %v744_v26, %v632_v25  ;;  %v166_v28 = vpop.f32.mrb[1].mxu1 }
  0xdd   :  { %v167_v29 = vadd.f32 %v632_v25, %v166_v28 }
  0xde   :  { %v246_v32 = vmax.f32 %v172_v27, 0.0 }
  0xdf   :  { %v245_v30 = vmax.f32 %v167_v29, 0.0  ;;  %v747_v31 = vpop.f32.mrb[2].mxu1 }
  0xe0   :  { %v182_v33 = vadd.f32 %v747_v31, %v632_v25  ;;  %v176_v34 = vpop.f32.mrb[3].mxu1 }
  0xe1   :  { %v177_v35 = vadd.f32 %v632_v25, %v176_v34  ;;  %774 = vmatprep.mubr.msk.f32.mxu1 %vm272_vm1, %v245_v30 }
  0xe2   :  { %v248_v36 = vmax.f32 %v182_v33, 0.0  ;;  %775 = vmatmul.mubr.msk.f32.vlgmr.msra.gmra.mrb[16].mxu1 %vm272_vm1, %v246_v32 }
  0xe3   :  { %v247_v37 = vmax.f32 %v177_v35, 0.0  ;;  %v750_v38 = vpop.f32.mrb[4].mxu1 }
  0xe4   :  { %v192_v39 = vadd.f32 %v750_v38, %v632_v25  ;;  %v186_v40 = vpop.f32.mrb[5].mxu1 }
  0xe5   :  { %777 = vmatprep.mubr.msk.f32.mxu1 %vm272_vm1, %v247_v37  ;;  %v187_v41 = vadd.f32 %v632_v25, %v186_v40 }
  0xe6   :  { %778 = vmatmul.mubr.msk.f32.gmra.mrb[18].mxu1 %vm272_vm1, %v248_v36  ;;  %v250_v42 = vmax.f32 %v192_v39, 0.0 }
  0xe7   :  { %v249_v43 = vmax.f32 %v187_v41, 0.0  ;;  %v753_v44 = vpop.f32.mrb[6].mxu1 }
  0xe8   :  { %v202_v45 = vadd.f32 %v753_v44, %v632_v25  ;;  %v196_v46 = vpop.f32.mrb[7].mxu1 }
  0xe9   :  { %780 = vmatprep.mubr.msk.f32.mxu1 %vm272_vm1, %v249_v43  ;;  %v197_v47 = vadd.f32 %v632_v25, %v196_v46 }
  0xea   :  { %781 = vmatmul.mubr.msk.f32.gmra.mrb[20].mxu1 %vm272_vm1, %v250_v42  ;;  %v252_v48 = vmax.f32 %v202_v45, 0.0 }
  0xeb   :  { %v251_v49 = vmax.f32 %v197_v47, 0.0  ;;  %v756_v50 = vpop.f32.mrb[8].mxu1 }
  0xec   :  { %v212_v51 = vadd.f32 %v756_v50, %v632_v25  ;;  %v206_v52 = vpop.f32.mrb[9].mxu1 }
  0xed   :  { %783 = vmatprep.mubr.msk.f32.mxu1 %vm272_vm1, %v251_v49  ;;  %v207_v53 = vadd.f32 %v632_v25, %v206_v52 }
  0xee   :  { %784 = vmatmul.mubr.msk.f32.gmra.mrb[22].mxu1 %vm272_vm1, %v252_v48  ;;  %v254_v54 = vmax.f32 %v212_v51, 0.0 }
  0xef   :  { %v253_v55 = vmax.f32 %v207_v53, 0.0  ;;  %v759_v56 = vpop.f32.mrb[10].mxu1 }
  0xf0   :  { %v222_v57 = vadd.f32 %v759_v56, %v632_v25  ;;  %v216_v58 = vpop.f32.mrb[11].mxu1 }
  0xf1   :  { %786 = vmatprep.mubr.msk.f32.mxu1 %vm272_vm1, %v253_v55  ;;  %v217_v59 = vadd.f32 %v632_v25, %v216_v58 }
  0xf2   :  { %787 = vmatmul.mubr.msk.f32.gmra.mrb[24].mxu1 %vm272_vm1, %v254_v54  ;;  %v256_v60 = vmax.f32 %v222_v57, 0.0 }
  0xf3   :  { %v255_v61 = vmax.f32 %v217_v59, 0.0  ;;  %v762_v62 = vpop.f32.mrb[12].mxu1 }
  0xf4   :  { %v232_v63 = vadd.f32 %v762_v62, %v632_v25  ;;  %v226_v0 = vpop.f32.mrb[13].mxu1 }
  0xf5   :  { %789 = vmatprep.mubr.msk.f32.mxu1 %vm272_vm1, %v255_v61  ;;  %v227_v1 = vadd.f32 %v632_v25, %v226_v0 }
  0xf6   :  { %790 = vmatmul.mubr.msk.f32.gmra.mrb[26].mxu1 %vm272_vm1, %v256_v60  ;;  %v258_v2 = vmax.f32 %v232_v63, 0.0 }
  0xf7   :  { %v257_v3 = vmax.f32 %v227_v1, 0.0  ;;  %v765_v4 = vpop.f32.mrb[14].mxu1 }
  0xf8   :  { %v242_v5 = vadd.f32 %v765_v4, %v632_v25  ;;  %v236_v6 = vpop.f32.mrb[15].mxu1 }
  0xf9   :  { %792 = vmatprep.mubr.msk.f32.mxu1 %vm272_vm1, %v257_v3  ;;  %v237_v7 = vadd.f32 %v632_v25, %v236_v6 }
  0xfa   :  { %793 = vmatmul.mubr.msk.f32.gmra.mrb[28].mxu1 %vm272_vm1, %v258_v2  ;;  %v260_v8 = vmax.f32 %v242_v5, 0.0 }
  0xfb   :  { %v259_v9 = vmax.f32 %v237_v7, 0.0 }
  0xfd   :  { %795 = vmatprep.mubr.msk.f32.mxu1 %vm272_vm1, %v259_v9  ;;  %v487_v9 = vpop.permute.xlu0 %486 }
  0xfe   :  { %796 = vmatmul.mubr.msk.f32.gmra.mrb[30].mxu1 %vm272_vm1, %v260_v8  ;;  %v482_v8 = vld [vmem:[%s1080_s5] sm:$0xff] }
 0x1b5   :  { %v776_v15 = vpop.f32.mrb[16].mxu1 }
 0x1b6   :  { %v393_v16 = vadd.f32 %v776_v15, %v649_v14  ;;  %v387_v17 = vpop.f32.mrb[17].mxu1 }
 0x1b7   :  { %v388_v18 = vadd.f32 %v649_v14, %v387_v17 }
 0x1b8   :  { %v467_v19 = vmax.f32 %v393_v16, 0.0 }
 0x1b9   :  { %v466_v20 = vmax.f32 %v388_v18, 0.0  ;;  %v779_v21 = vpop.f32.mrb[18].mxu1 }
 0x1ba   :  { %v403_v22 = vadd.f32 %v779_v21, %v649_v14  ;;  %v397_v23 = vpop.f32.mrb[19].mxu1 }
 0x1bb   :  { %v846_v25 = vpack.c.bf16 %v467_v19, %v466_v20  ;;  %v398_v26 = vadd.f32 %v649_v14, %v397_v23 }
 0x1bc   :  { %v469_v27 = vmax.f32 %v403_v22, 0.0 }
 0x1bd   :  { %v468_v28 = vmax.f32 %v398_v26, 0.0  ;;  %848 = vmatpush3.bf16.xpose.msk.msra.mxu0 %vm1040_vm3, %v846_v25  ;;  %v782_v29 = vpop.f32.mrb[20].mxu1 }
 0x1be   :  { %v413_v30 = vadd.f32 %v782_v29, %v649_v14  ;;  %v407_v31 = vpop.f32.mrb[21].mxu1  ;;  %849 = vmatprep.subr.bf16.mxu0 %v886_v10 }
 0x1bf   :  { %v850_v32 = vpack.c.bf16 %v469_v27, %v468_v28  ;;  %v408_v33 = vadd.f32 %v649_v14, %v407_v31 }
 0x1c0   :  { %v471_v34 = vmax.f32 %v413_v30, 0.0 }
 0x1c1   :  { %v470_v35 = vmax.f32 %v408_v33, 0.0  ;;  %v785_v36 = vpop.f32.mrb[22].mxu1 }
 0x1c2   :  { %v423_v37 = vadd.f32 %v785_v36, %v649_v14  ;;  %v417_v38 = vpop.f32.mrb[23].mxu1 }
 0x1c3   :  { %v854_v39 = vpack.c.bf16 %v471_v34, %v470_v35  ;;  %v418_v40 = vadd.f32 %v649_v14, %v417_v38 }
 0x1c4   :  { %v473_v41 = vmax.f32 %v423_v37, 0.0 }
 0x1c5   :  { %852 = vmatpush3.bf16.xpose.msk.msra.mxu0 %vm1040_vm3, %v850_v32  ;;  %v472_v42 = vmax.f32 %v418_v40, 0.0  ;;  %v788_v43 = vpop.f32.mrb[24].mxu1 }
 0x1c6   :  { %853 = vmatprep.subr.bf16.mxu0 %v886_v10  ;;  %v433_v44 = vadd.f32 %v788_v43, %v649_v14  ;;  %v427_v45 = vpop.f32.mrb[25].mxu1 }
 0x1c7   :  { %v858_v46 = vpack.c.bf16 %v473_v41, %v472_v42  ;;  %v428_v47 = vadd.f32 %v649_v14, %v427_v45 }
 0x1c8   :  { %v475_v48 = vmax.f32 %v433_v44, 0.0 }
 0x1c9   :  { %v474_v49 = vmax.f32 %v428_v47, 0.0  ;;  %v791_v50 = vpop.f32.mrb[26].mxu1 }
 0x1ca   :  { %v443_v51 = vadd.f32 %v791_v50, %v649_v14  ;;  %v437_v52 = vpop.f32.mrb[27].mxu1 }
 0x1cb   :  { %v862_v53 = vpack.c.bf16 %v475_v48, %v474_v49  ;;  %v438_v54 = vadd.f32 %v649_v14, %v437_v52 }
 0x1cc   :  { %v477_v55 = vmax.f32 %v443_v51, 0.0 }
 0x1cd   :  { %856 = vmatpush3.bf16.xpose.msk.msra.mxu0 %vm1040_vm3, %v854_v39  ;;  %v476_v56 = vmax.f32 %v438_v54, 0.0  ;;  %v794_v57 = vpop.f32.mrb[28].mxu1 }
 0x1ce   :  { %857 = vmatprep.subr.bf16.mxu0 %v886_v10  ;;  %v453_v58 = vadd.f32 %v794_v57, %v649_v14  ;;  %v447_v59 = vpop.f32.mrb[29].mxu1 }
 0x1cf   :  { %v866_v60 = vpack.c.bf16 %v477_v55, %v476_v56  ;;  %v448_v61 = vadd.f32 %v649_v14, %v447_v59 }
 0x1d0   :  { %v479_v62 = vmax.f32 %v453_v58, 0.0 }
 0x1d1   :  { %v478_v63 = vmax.f32 %v448_v61, 0.0  ;;  %v797_v0 = vpop.f32.mrb[30].mxu1 }
 0x1d2   :  { %v463_v1 = vadd.f32 %v797_v0, %v649_v14  ;;  %v457_v2 = vpop.f32.mrb[31].mxu1 }
 0x1d3   :  { %v870_v3 = vpack.c.bf16 %v479_v62, %v478_v63  ;;  %v458_v4 = vadd.f32 %v649_v14, %v457_v2 }
 0x1d4   :  { %v481_v5 = vmax.f32 %v463_v1, 0.0 }
 0x1d5   :  { %860 = vmatpush3.bf16.xpose.msk.msra.mxu0 %vm1040_vm3, %v858_v46  ;;  %v480_v6 = vmax.f32 %v458_v4, 0.0 }
 0x1d6   :  { %861 = vmatprep.subr.bf16.mxu0 %v886_v10 }
 0x1d7   :  { %v874_v7 = vpack.c.bf16 %v481_v5, %v480_v6 }
 0x1dd   :  { %864 = vmatpush3.bf16.xpose.msk.msra.mxu0 %vm1040_vm3, %v862_v53 }
 0x1de   :  { %865 = vmatprep.subr.bf16.mxu0 %v886_v10 }
 0x1e5   :  { %868 = vmatpush3.bf16.xpose.msk.msra.mxu0 %vm1040_vm3, %v866_v60 }
 0x1e6   :  { %869 = vmatprep.subr.bf16.mxu0 %v886_v10 }
 0x1ed   :  { %872 = vmatpush3.bf16.xpose.msk.msra.mxu0 %vm1040_vm3, %v870_v3 }
 0x1ee   :  { %873 = vmatprep.subr.bf16.mxu0 %v886_v10 }
 0x1f5   :  { %876 = vmatpush3.bf16.xpose.msk.msra.mxu0 %vm1040_vm3, %v874_v7 }
 0x1fc   :  { %831 = vmatmul.mubr.msk.f32.vlgmr.msra.gmra.mrb[0].mxu0 %vm272_vm1, %v482_v8 }
 0x2cf   :  { %v606_v11 = vpop.f32.mrb[0].mxu0 }
 0x2d0   :  { %v607_v12 = vadd.f32 %v606_v11, %v487_v9  ;;  %v832_v13 = vpop.f32.mrb[1].mxu0 }
 0x2d2   :  { %v610_v14 = vrot.slane %v607_v12, 4 }
 0x2d4   :  { %v611_v15 = vmax.f32 %v607_v12, %v610_v14 }
 0x2d6   :  { %v612_v16 = vrot.slane %v611_v15, 2 }
 0x2d8   :  { %v613_v17 = vmax.f32 %v611_v15, %v612_v16 }
 0x2da   :  { %v614_v18 = vrot.slane %v613_v17, 1 }
 0x2dc   :  { %v615_v19 = vmax.f32 %v613_v17, %v614_v18 }
 0x2de   :  { %v616_v10 = vsub.f32 %v607_v12, %v615_v19 }
 0x2e0   :  { %v617_v20 = vmul.f32 1.442695, %v616_v10 }
 0x2e2   :  { %882 = vpow2.f32 %v617_v20 }
 0x2ec   :  { %v883_v21 = vpop.eup %882 }
 0x2ed   :  { %v619_v22 = vrot.slane %v883_v21, 4 }
 0x2ef   :  { %v620_v23 = vadd.f32 %v883_v21, %v619_v22 }
 0x2f1   :  { %v621_v24 = vrot.slane %v620_v23, 2 }
 0x2f3   :  { %v622_v25 = vadd.f32 %v621_v24, %v620_v23 }
 0x2f5   :  { %v623_v26 = vrot.slane %v622_v25, 1 }
 0x2f7   :  { %v624_v27 = vadd.f32 %v623_v26, %v622_v25 }
 0x2f9   :  { %884 = vrcp.f32 %v624_v27 }
 0x303   :  { %v885_v28 = vpop.eup %884 }
 0x304   :  { %v626_v29 = vmul.f32 %v885_v28, %v883_v21 }
 0x306   :  { %627 = vst [vmem:[%s1081_s7] sm:$0xff] %v626_v29 }

</bundles_post_ra>
